<compile_context>
chip_gen: v5e
topology: v5e:2x2
jax: 0.10.0
libtpu: 0.0.40
codegen_flags: <defaults>
</compile_context>

<pallas_src>
import jax
import jax.numpy as jnp
import numpy as np
from jax.experimental import pallas as pl
from jax.experimental.pallas import tpu as pltpu


def _round_up(x, m):
    return (x + m - 1) // m * m


# ---------------------------------------------------------------------------
# Pallas kernel: symmetric combine + fused 1x5 conv (single MXU matmul).
# ---------------------------------------------------------------------------
def mesh_conv_kernel(g_ref, w_ref, b_ref, o_ref):
    # g_ref: (TILE_N, 5*C_in)   gathered neighbour taps, lane-concatenated
    # w_ref: (5*C_in, C_out_p)  fused tap-major conv weights
    # b_ref: (1, C_out_p)       f32 bias
    # o_ref: (TILE_N, C_out_p)  f32 output
    c = g_ref.shape[-1] // 5
    g = g_ref[...].astype(jnp.float32)          # one contiguous tile load
    e0 = g[:, 0 * c:1 * c]
    e1 = g[:, 1 * c:2 * c]
    e2 = g[:, 2 * c:3 * c]
    e3 = g[:, 3 * c:4 * c]
    e4 = g[:, 4 * c:5 * c]
    # MeshCNN symmetric edge features, lane-concatenated into one (TILE_N, 5*C_in)
    # tile so the 5 conv taps become a single fused matmul.
    s = jnp.concatenate(
        [e0, e1 + e3, e2 + e4, jnp.abs(e1 - e3), jnp.abs(e2 - e4)], axis=-1)
    acc = jnp.dot(s.astype(w_ref.dtype), w_ref[...],
                  preferred_element_type=jnp.float32)
    o_ref[...] = (acc + b_ref[...]).astype(o_ref.dtype)


def _vmem_capacity_bytes():
    try:
        return int(pltpu.get_tpu_info().vmem_capacity_bytes)
    except Exception:
        return 64 * 1024 * 1024   # conservative: v7x per-TensorCore VMEM


def mesh_conv_pallas(g, w, b, *, tile_n=None):
    # g: (N, 5*C_in) compute dtype; w: (5*C_in, C_out_p); b: (1, C_out_p) f32
    n, kc = g.shape
    c_out_p = w.shape[1]

    vmem_cap = _vmem_capacity_bytes()
    # double-buffered input tile + double-buffered output tile, per row
    row_bytes = 2 * kc * g.dtype.itemsize + 2 * c_out_p * 4
    if tile_n is None:
        budget = max(vmem_cap // 3, 16 * 1024 * 1024)
        tile_n = min(8192, max(512, budget // max(row_bytes, 1)))
        tile_n = (tile_n // 512) * 512 if tile_n >= 512 else _round_up(tile_n, 8)
    tile_n = int(min(tile_n, _round_up(n, 8)))

    n_pad = _round_up(n, tile_n)
    if n_pad != n:
        g = jnp.pad(g, ((0, n_pad - n), (0, 0)))
    grid_n = n_pad // tile_n

    est_vmem = tile_n * row_bytes + kc * c_out_p * w.dtype.itemsize + c_out_p * 4
    vmem_limit = int(min(max(est_vmem * 3 // 2 + (4 << 20), 16 << 20),
                         vmem_cap * 3 // 4))

    cost = pl.CostEstimate(
        flops=int(2 * n_pad * kc * c_out_p + 6 * n_pad * kc),
        transcendentals=0,
        bytes_accessed=int(n_pad * kc * g.dtype.itemsize
                           + kc * c_out_p * w.dtype.itemsize
                           + c_out_p * 4
                           + n_pad * c_out_p * 4))

    out = pl.pallas_call(
        mesh_conv_kernel,
        out_shape=jax.ShapeDtypeStruct((n_pad, c_out_p), jnp.float32),
        grid_spec=pltpu.PrefetchScalarGridSpec(
            num_scalar_prefetch=0,
            grid=(grid_n,),
            in_specs=[
                pl.BlockSpec((tile_n, kc), lambda i: (i, 0)),
                pl.BlockSpec((kc, c_out_p), lambda i: (0, 0)),   # resident weights
                pl.BlockSpec((1, c_out_p), lambda i: (0, 0)),    # resident bias
            ],
            out_specs=pl.BlockSpec((tile_n, c_out_p), lambda i: (i, 0)),
        ),
        compiler_params=pltpu.CompilerParams(
            dimension_semantics=("parallel",),
            vmem_limit_bytes=vmem_limit),
        cost_estimate=cost,
    )(g, w, b)
    return out[:n]


# ---------------------------------------------------------------------------
# Glue reproducing MeshConv.pad_graph_mat / create_graph_mat index plumbing.
# ---------------------------------------------------------------------------
def pad_graph_mat(graph_mat_edges, edges_count, max_edges):
    # Prepend self index, THEN zero-pad rows to max_edges (matches the PyTorch
    # module: the +1 shift happens later in the gather).  int32 end to end.
    g = jnp.concatenate(
        [jnp.arange(edges_count, dtype=jnp.int32)[:, None],
         graph_mat_edges.astype(jnp.int32)], axis=1)
    g = jnp.pad(g, ((0, max_edges - edges_count), (0, 0)))
    return g[None]                                  # (1, max_edges, 5)


def gather_neighbor_features(x, meshes):
    # x: (B, C_in, E, 1) -> gathered f: (B, E, 5, C_in)
    # TODO(synk): move this data-dependent gather into the kernel via
    # PrefetchScalarGridSpec (index table in SMEM) + manual make_async_copy row
    # DMAs to avoid materialising the 5x-expanded tensor in HBM.
    x = x[..., 0]                                   # squeeze(-1): (B, C_in, E)
    B, C, E = x.shape
    G = jnp.concatenate(
        [pad_graph_mat(gm, ec, E) for gm, ec in meshes], axis=0)  # (B, E, 5)
    idx = G + 1                                     # slot 0 = zero-pad row
    x_pad = jnp.concatenate([jnp.zeros((B, C, 1), x.dtype), x], axis=2)
    xt = jnp.transpose(x_pad, (0, 2, 1))            # (B, E+1, C)
    f = xt[jnp.arange(B)[:, None, None], idx, :]    # (B, E, 5, C)
    return f


def mesh_conv_forward(x, meshes, weight, bias, *, compute_dtype=jnp.bfloat16,
                      tile_n=None):
    # x: (B, C_in, E, 1); weight: (C_out, C_in, 1, 5); bias: (C_out,)
    B, C_in, E, _ = x.shape
    C_out = weight.shape[0]

    f = gather_neighbor_features(x, meshes)          # (B, E, 5, C_in), contiguous
    # zero-copy relayout of the dominant operand (no HBM transpose)
    g = f.reshape(B * E, 5 * C_in).astype(compute_dtype)

    # Conv2d(1x5) weights fused tap-major: row j*C_in + c holds weight[o, c, 0, j]
    # so dot(s, w) == sum_j s_j @ weight[:, :, 0, j].T
    w = jnp.transpose(weight[:, :, 0, :], (2, 1, 0)).reshape(5 * C_in, C_out)

    # lane-dense output path: pad C_out to a multiple of 128, slice back after
    C_out_p = _round_up(C_out, 128)
    w = jnp.pad(w, ((0, 0), (0, C_out_p - C_out))).astype(compute_dtype)
    b = jnp.pad(bias.astype(jnp.float32), (0, C_out_p - C_out))[None, :]

    out = mesh_conv_pallas(g, w, b, tile_n=tile_n)   # (B*E, C_out_p) f32
    out = out[:, :C_out].reshape(B, E, C_out)
    return jnp.transpose(out, (0, 2, 1))[..., None]  # (B, C_out, E, 1)


def mesh_conv_reference(x, meshes, weight, bias):
    # pure-JAX f32 reference of the same forward (for correctness check)
    f = gather_neighbor_features(x, meshes)          # (B, E, 5, C)
    e = [f[..., j, :] for j in range(5)]
    feats = jnp.stack(
        [e[0], e[1] + e[3], e[2] + e[4],
         jnp.abs(e[1] - e[3]), jnp.abs(e[2] - e[4])], axis=2)    # (B, E, 5, C)
    out = jnp.einsum('bejc,ocj->beo', feats, weight[:, :, 0, :],
                     precision='highest') + bias
    return out.transpose(0, 2, 1)[..., None]


if __name__ == "__main__":
    key = jax.random.PRNGKey(0)
    B, C_in, C_out, E, K = 2, 4, 8, 16, 5
    edges_counts = [16, 12]   # second mesh is row-padded, exercising pad_graph_mat

    k_x, k_w, k_b, k_g0, k_g1 = jax.random.split(key, 5)
    x = jax.random.normal(k_x, (B, C_in, E, 1), dtype=jnp.float32)
    weight = jax.random.normal(k_w, (C_out, C_in, 1, K), dtype=jnp.float32) * 0.1
    bias = jax.random.normal(k_b, (C_out,), dtype=jnp.float32) * 0.1

    meshes = []
    for ec, kg in zip(edges_counts, [k_g0, k_g1]):
        gm = jax.random.randint(kg, (ec, 4), 0, ec, dtype=jnp.int32)
        meshes.append((gm, ec))

    out = jax.block_until_ready(mesh_conv_forward(x, meshes, weight, bias))
    ref = jax.block_until_ready(mesh_conv_reference(x, meshes, weight, bias))

    assert out.shape == (B, C_out, E, 1)
    np.testing.assert_allclose(np.asarray(out), np.asarray(ref),
                               rtol=2e-2, atol=2e-2)
    print("KERNEL_OK")
</pallas_src>

<mosaic_0001>
module attributes {stable_mosaic.version = 11 : i64} {
  func.func @mesh_conv_kernel(%arg0: i32, %arg1: memref<32x20xbf16, #tpu.memory_space<vmem>>, %arg2: memref<20x128xbf16, #tpu.memory_space<vmem>>, %arg3: memref<1x128xf32, #tpu.memory_space<vmem>>, %arg4: memref<32x128xf32, #tpu.memory_space<vmem>>) attributes {dimension_semantics = [#tpu.dimension_semantics<parallel>], iteration_bounds = array<i64: 1>, scalar_prefetch = 0 : i64, scratch_operands = 0 : i64, tpu.core_type = #tpu.core_type<tc>, window_params = [{transform_indices = @transform_0, window_bounds = array<i64: 32, 20>}, {pipeline_mode = #tpu.pipeline_mode<synchronous>, transform_indices = @transform_1, window_bounds = array<i64: 20, 128>}, {pipeline_mode = #tpu.pipeline_mode<synchronous>, transform_indices = @transform_2, window_bounds = array<i64: 1, 128>}, {transform_indices = @transform_3, window_bounds = array<i64: 32, 128>}]} {
    %c0 = arith.constant 0 : index
    %c0_0 = arith.constant 0 : index
    %0 = vector.load %arg1[%c0, %c0_0] : memref<32x20xbf16, #tpu.memory_space<vmem>>, vector<32x20xbf16>
    %1 = arith.extf %0 : vector<32x20xbf16> to vector<32x20xf32>
    %2 = vector.extract_strided_slice %1 {offsets = [0, 0], sizes = [32, 4], strides = [1, 1]} : vector<32x20xf32> to vector<32x4xf32>
    %3 = vector.extract_strided_slice %1 {offsets = [0, 4], sizes = [32, 4], strides = [1, 1]} : vector<32x20xf32> to vector<32x4xf32>
    %4 = vector.extract_strided_slice %1 {offsets = [0, 8], sizes = [32, 4], strides = [1, 1]} : vector<32x20xf32> to vector<32x4xf32>
    %5 = vector.extract_strided_slice %1 {offsets = [0, 12], sizes = [32, 4], strides = [1, 1]} : vector<32x20xf32> to vector<32x4xf32>
    %6 = vector.extract_strided_slice %1 {offsets = [0, 16], sizes = [32, 4], strides = [1, 1]} : vector<32x20xf32> to vector<32x4xf32>
    %7 = arith.addf %3, %5 : vector<32x4xf32>
    %8 = arith.addf %4, %6 : vector<32x4xf32>
    %9 = arith.subf %3, %5 : vector<32x4xf32>
    %10 = math.absf %9 : vector<32x4xf32>
    %11 = arith.subf %4, %6 : vector<32x4xf32>
    %12 = math.absf %11 : vector<32x4xf32>
    %13 = tpu.concatenate %2, %7, %8, %10, %12 in 1 : vector<32x4xf32>, vector<32x4xf32>, vector<32x4xf32>, vector<32x4xf32>, vector<32x4xf32> -> vector<32x20xf32>
    %14 = arith.truncf %13 : vector<32x20xf32> to vector<32x20xbf16>
    %c0_1 = arith.constant 0 : index
    %c0_2 = arith.constant 0 : index
    %15 = vector.load %arg2[%c0_1, %c0_2] : memref<20x128xbf16, #tpu.memory_space<vmem>>, vector<20x128xbf16>
    %cst = arith.constant dense<0.000000e+00> : vector<32x128xf32>
    %16 = tpu.matmul %14, %15, %cst {dimension_numbers = #tpu.dot_dimension_numbers<[1], [0], [0], [1], [0, 0, 1, 1], [], []>} : vector<32x20xbf16>, vector<20x128xbf16>, vector<32x128xf32> -> vector<32x128xf32>
    %c0_3 = arith.constant 0 : index
    %c0_4 = arith.constant 0 : index
    %17 = vector.load %arg3[%c0_3, %c0_4] : memref<1x128xf32, #tpu.memory_space<vmem>>, vector<1x128xf32>
    %18 = vector.broadcast %17 : vector<1x128xf32> to vector<32x128xf32>
    %19 = arith.addf %16, %18 : vector<32x128xf32>
    %c0_5 = arith.constant 0 : index
    %c0_6 = arith.constant 0 : index
    %20 = vector.load %arg4[%c0_5, %c0_6] : memref<32x128xf32, #tpu.memory_space<vmem>>, vector<32x128xf32>
    tpu.vector_store %arg4[%c0_5, %c0_6], %19 {strides = array<i32>} : memref<32x128xf32, #tpu.memory_space<vmem>>, vector<32x128xf32>,
    return
  }
  func.func @transform_0(%arg0: i32) -> (i32, i32) {
    %c0_i32 = arith.constant 0 : i32
    %c0_i32_0 = arith.constant 0 : i32
    return %arg0, %c0_i32 : i32, i32
  }
  func.func @transform_1(%arg0: i32) -> (i32, i32) {
    %c0_i32 = arith.constant 0 : i32
    %c0_i32_0 = arith.constant 0 : i32
    %c0_i32_1 = arith.constant 0 : i32
    return %c0_i32, %c0_i32_0 : i32, i32
  }
  func.func @transform_2(%arg0: i32) -> (i32, i32) {
    %c0_i32 = arith.constant 0 : i32
    %c0_i32_0 = arith.constant 0 : i32
    %c0_i32_1 = arith.constant 0 : i32
    return %c0_i32, %c0_i32_0 : i32, i32
  }
  func.func @transform_3(%arg0: i32) -> (i32, i32) {
    %c0_i32 = arith.constant 0 : i32
    %c0_i32_0 = arith.constant 0 : i32
    return %arg0, %c0_i32 : i32, i32
  }
}

</mosaic_0001>

<bundles_post_ra>
// kernel: tpu_custom_call.1
= control target key start
LH: loop header
LB: loop body
LE: loop exit
PB: predicated region body
PF: predicated region fallthrough
CT: control target
= control target key end

     0   :  { %s288_s0 = inlined_call_operand.vmem [shape: bf16[32,20], index: 0, kind: input, shape index: {}]   ;;  %s289_s1 = inlined_call_operand.vmem [shape: bf16[20,128], index: 1, kind: input, shape index: {}]   ;;  %s290_s2 = inlined_call_operand.vmem [shape: f32[1,128], index: 2, kind: input, shape index: {}]   ;;  %s291_s3 = inlined_call_operand.hbm [shape: f32[32,128], index: 3, kind: output, shape index: {}]  }
   0x1   :  { %v166_v0 = vld [vmem:[%s288_s0] sm:$0xff]  }
   0x2   :  { %v167_v1 = vunpack.c.l.bf16 %v166_v0  ;;  %v168_v2 = vunpack.c.h.bf16 %v166_v0 }
   0x3   :  { %8 = vsyncpa [#allocation3], 0  ;;  %v173_v3 = vld [vmem:[%s288_s0 + $0x8] sm:$0xff]   ;;  %s227_s16 = smov 120   ;;  %vm113_vm0 = vcmask 1041408   ;;  %s228_s0 = smov 8  }
   0x4   :  { %v180_v4 = vpack.i.bf16 %v168_v2, %v167_v1  ;;  %v171_v5 = vunpack.c.l.bf16 %v173_v3  ;;  %v172_v6 = vunpack.c.h.bf16 %v173_v3  ;;  %v92_v8 = vld [vmem:[%s289_s1 + $0x8] sm:$0x3]  ;;  %v164_v28 = vld [vmem:[%s289_s1] sm:$0xff]  ;;  %vm68_vm1 = vcmask 31744   ;;  %s229_s22 = smov [#allocation2]   ;;  %s146_s26 = sshll.u32 %s291_s3, 4  ;;  %s147_s26 = int_to_ptr.hbm [resolvable:$true] %s146_s26 }
   0x5   :  { %v102_v9 = vunpack.c.l.b16 %v92_v8  ;;  %vm73_vm2 = vcmask 64512   ;;  %vm78_vm3 = vcmask 97280   ;;  %vm83_vm4 = vcmask 130048   ;;  %v200_v57 = vld [vmem:[%s290_s2] ss:$0 sm:$0xff]  ;;  %s144_s23 = sshll.u32 %s229_s22, 4  ;;  %s145_s23 = int_to_ptr.vmem [resolvable:$true] %s144_s23 }
   0x6   :  { %181 = vrot.lane.b32.xlu0 %v180_v4, %s227_s16  ;;  %v185_v7 = vpack.i.bf16 %v172_v6, %v171_v5  ;;  %vm106_vm5 = vcmask 162816   ;;  %s230_s2 = smov 128  }
   0x7   :  { %v104_v10 = vpack.c.b16 %v102_v9, %v102_v9 }
   0x9   :  { %v115_v11 = vsel %vm113_vm0, %v104_v10, 0 }
   0xa   :  { %123 = vmatpush.bf16.msra.mxu0 %v115_v11  ;;  %174 = vmatpush.bf16.msra.mxu1 %v115_v11 }
   0xe   :  { %186 = vrot.lane.b32.xlu0 %v185_v7, %s227_s16  ;;  %124 = vmatpush.bf16.msra.mxu0 %v164_v28 }
   0xf   :  { %175 = vmatpush.bf16.msra.mxu1 %v164_v28 }
  0x78   :  { %v182_v12 = vpop.permute.xlu0 %181 }
  0x79   :  { %v184_v13 = vunpack.i.h.bf16 %v182_v12  ;;  %v183_v14 = vunpack.i.l.bf16 %v182_v12 }
  0x7b   :  { %v45_v15 = vsub.f32 %v168_v2, %v184_v13  ;;  %v44_v16 = vsub.f32 %v167_v1, %v183_v14  ;;  %v41_v29 = vadd.f32 %v184_v13, %v168_v2  ;;  %v40_v30 = vadd.f32 %v183_v14, %v167_v1 }
  0x7d   :  { %v48_v17 = vand.u32 2147483647, %v44_v16  ;;  %v49_v18 = vand.u32 2147483647, %v45_v15  ;;  %v70_v31 = vsel %vm68_vm1, %v168_v2, %v41_v29  ;;  %v69_v32 = vsel %vm68_vm1, %v167_v1, %v40_v30 }
  0x7e   :  { %v75_v36 = vsel %vm73_vm2, %v70_v31, %v41_v29  ;;  %v74_v37 = vsel %vm73_vm2, %v69_v32, %v40_v30 }
  0x7f   :  { %v190_v19 = vpack.i.bf16 %v49_v18, %v48_v17 }
  0x80   :  { %v187_v20 = vpop.permute.xlu0 %186 }
  0x81   :  { %v189_v21 = vunpack.i.h.bf16 %v187_v20  ;;  %v188_v22 = vunpack.i.l.bf16 %v187_v20  ;;  %191 = vrot.lane.b32.xlu1 %v190_v19, %s228_s0 }
  0x83   :  { %v47_v23 = vsub.f32 %v172_v6, %v189_v21  ;;  %v46_v24 = vsub.f32 %v171_v5, %v188_v22  ;;  %v43_v38 = vadd.f32 %v189_v21, %v172_v6  ;;  %v42_v39 = vadd.f32 %v188_v22, %v171_v5 }
  0x85   :  { %v51_v25 = vand.u32 2147483647, %v47_v23  ;;  %v50_v26 = vand.u32 2147483647, %v46_v24  ;;  %v72_v45 = vsel %vm68_vm1, %v172_v6, %v43_v38  ;;  %v71_v46 = vsel %vm68_vm1, %v171_v5, %v42_v39 }
  0x86   :  { %v77_v50 = vsel %vm73_vm2, %v72_v45, %v43_v38  ;;  %v76_v51 = vsel %vm73_vm2, %v71_v46, %v42_v39 }
  0x87   :  { %v195_v27 = vpack.i.bf16 %v51_v25, %v50_v26 }
  0x89   :  { %196 = vrot.lane.b32.xlu1 %v195_v27, %s228_s0 }
  0xf3   :  { %v192_v33 = vpop.permute.xlu1 %191 }
  0xf4   :  { %v194_v34 = vunpack.i.h.bf16 %v192_v33  ;;  %v193_v35 = vunpack.i.l.bf16 %v192_v33 }
  0xf6   :  { %v80_v40 = vsel %vm78_vm3, %v75_v36, %v194_v34  ;;  %v79_v41 = vsel %vm78_vm3, %v74_v37, %v193_v35 }
  0xf7   :  { %v84_v42 = vsel %vm83_vm4, %v79_v41, %v193_v35  ;;  %v85_v43 = vsel %vm83_vm4, %v80_v40, %v194_v34 }
  0xf8   :  { %v88_v44 = vpack.c.bf16 %v85_v43, %v84_v42 }
  0xfa   :  { %162 = vmatmul.msk.bf16.vlgmr.msra.gmra.mxu0 %vm106_vm5, %v88_v44 }
  0xfb   :  { %v197_v47 = vpop.permute.xlu1 %196 }
  0xfc   :  { %v199_v48 = vunpack.i.h.bf16 %v197_v47  ;;  %v198_v49 = vunpack.i.l.bf16 %v197_v47 }
  0xfe   :  { %v82_v52 = vsel %vm78_vm3, %v77_v50, %v199_v48  ;;  %v81_v53 = vsel %vm78_vm3, %v76_v51, %v198_v49 }
  0xff   :  { %v86_v54 = vsel %vm83_vm4, %v81_v53, %v198_v49  ;;  %v87_v55 = vsel %vm83_vm4, %v82_v52, %v199_v48 }
 0x100   :  { %v89_v56 = vpack.c.bf16 %v87_v55, %v86_v54 }
 0x102   :  { %163 = vmatmul.msk.bf16.vlgmr.msra.gmra.mxu1 %vm106_vm5, %v89_v56 }
 0x177   :  { %v126_v58 = vpop.f32.mrf.mxu0 }
 0x178   :  { %v127_v59 = vadd.f32 %v200_v57, %v126_v58 }
 0x17a   :  { %136 = vst [vmem:[#allocation2] sm:$0xff] %v127_v59 }
 0x17f   :  { %v128_v60 = vpop.f32.mrf.mxu0  ;;  %v131_v61 = vpop.f32.mrf.mxu1 }
 0x180   :  { %v129_v62 = vadd.f32 %v200_v57, %v128_v60  ;;  %v132_v63 = vadd.f32 %v200_v57, %v131_v61 }
 0x182   :  { %137 = vst [vmem:[#allocation2 + $0x8] sm:$0xff] %v129_v62 }
 0x183   :  { %138 = vst [vmem:[#allocation2 + $0x10] sm:$0xff] %v132_v63 }
 0x187   :  { %v133_v0 = vpop.f32.mrf.mxu1 }
 0x188   :  { %v134_v1 = vadd.f32 %v200_v57, %v133_v0 }
 0x18a   :  { %139 = vst [vmem:[#allocation2 + $0x18] sm:$0xff] %v134_v1 }
 0x18b   :  { %152 = dma.vmem_to_hbm [thread:$0]  %s145_s23, 512, %s147_s26, [#allocation3], %s230_s2, %s230_s2, %s228_s0  }
 0x18c   :  { %225 = dma.done.wait [#allocation3], 512  }
 0x18d   :  { %226 = vsyncadd [#allocation3], 4294966784 }
 0x18e   :  { %157 = vsyncpa [#allocation3], 1 }

</bundles_post_ra>
